<compile_context>
chip_gen: v7x
topology: tpu7x:2x2x1
jax: 0.10.0
libtpu: 0.0.40
codegen_flags: <defaults>
</compile_context>

<pallas_src>
import functools
import math

import jax
import jax.numpy as jnp
from jax.experimental import pallas as pl
from jax.experimental.pallas import tpu as pltpu

_LANES = 128
_SUBLANES = 8
# (2048, 128) f32 = 1 MiB per input per pipeline buffer: 2 inputs x 2 buffers
# = 4 MiB, comfortably inside v5e's 16 MiB / v7x's 32 MiB scoped-VMEM defaults
# while already amortizing the ~0.35 us per-grid-step overhead (~85% roofline).
_MAX_BLOCK_ROWS = 2048
# Leading "parallel" grid axis -> both TensorCores on v7x; harmless on v5e/v6e.
_NUM_PARTIALS = 2


def _loss_partial_kernel(yhat_ref, y_ref, out_ref, *, mode, block_rows,
                         steps_per_core, total_blocks):
    c = pl.program_id(0)          # partial-sum slot (sharded across cores)
    i = pl.program_id(1)          # block step within this slot

    @pl.when(i == 0)
    def _init():
        out_ref[...] = jnp.zeros_like(out_ref)

    # Global block index; the last core may overshoot (its extra steps are
    # clamped in the index_map and skipped here).
    g = c * steps_per_core + i

    @pl.when(g < total_blocks)
    def _accumulate():
        yhat = yhat_ref[...].astype(jnp.float32)
        y = y_ref[...].astype(jnp.float32)
        diff = y - yhat
        if mode == "regressionL1":        # nn.L1Loss: mean(|yhat - y|)
            val = jnp.abs(diff)
        elif mode == "regressionL2":      # nn.MSELoss: mean((yhat - y)^2)
            val = diff * diff
        elif mode == "regressionMRE":     # MRELoss: mean(|y - yhat| / y)
            # divide moved to the EUP slot, keeps the vector ALU free
            val = jnp.abs(diff) * pl.reciprocal(y, approx=False)
        else:
            raise ValueError(f"taskType {mode} not valid")
        # Fold the (block_rows, 128) tile into an (8, 128) vector accumulator:
        # pure vreg adds; the single cross-lane reduce happens in the wrapper.
        tile_sum = val.reshape(block_rows // _SUBLANES, _SUBLANES, _LANES).sum(axis=0)
        out_ref[...] += tile_sum[None, :, :]


def my_loss(yhat, y, task_type="regressionL1"):
    """Pallas-TPU implementation of MyLoss.forward for the given taskType."""
    if task_type not in ("regressionL1", "regressionL2", "regressionMRE"):
        raise ValueError(f"taskType {task_type} not valid")

    n = math.prod(yhat.shape) if yhat.shape else 1
    rows_needed = -(-n // _LANES)
    block_rows = min(_MAX_BLOCK_ROWS,
                     ((rows_needed + _SUBLANES - 1) // _SUBLANES) * _SUBLANES)
    total_blocks = -(-rows_needed // block_rows)
    num_partials = min(_NUM_PARTIALS, total_blocks)
    steps_per_core = -(-total_blocks // num_partials)

    padded_rows = total_blocks * block_rows
    padded_n = padded_rows * _LANES

    # Padding values chosen so padded elements contribute exactly 0 to the sum:
    #   L1/L2: pad both with 0 -> |0-0| = 0
    #   MRE:   pad both with 1 -> |1-1|/1 = 0   (avoids 0/0)
    pad_val = 1.0 if task_type == "regressionMRE" else 0.0

    def prep(x):
        flat = x.reshape(-1)              # keep original dtype (no f32 upcast copy)
        if padded_n != n:                 # skip the pad copy in the aligned case
            flat = jnp.pad(flat, (0, padded_n - n), constant_values=pad_val)
        return flat.reshape(padded_rows, _LANES)

    yhat2d = prep(yhat)
    y2d = prep(y)

    def in_map(c, i):
        # Clamp so the (rare) overshoot step of the last core still reads an
        # in-bounds block; its contribution is skipped inside the kernel.
        return (jnp.minimum(c * steps_per_core + i, total_blocks - 1), 0)

    kernel = functools.partial(
        _loss_partial_kernel,
        mode=task_type,
        block_rows=block_rows,
        steps_per_core=steps_per_core,
        total_blocks=total_blocks,
    )

    partials = pl.pallas_call(
        kernel,
        out_shape=jax.ShapeDtypeStruct((num_partials, _SUBLANES, _LANES),
                                       jnp.float32),
        grid_spec=pltpu.PrefetchScalarGridSpec(
            num_scalar_prefetch=0,
            grid=(num_partials, steps_per_core),
            in_specs=[
                pl.BlockSpec((block_rows, _LANES), in_map),
                pl.BlockSpec((block_rows, _LANES), in_map),
            ],
            out_specs=pl.BlockSpec((1, _SUBLANES, _LANES),
                                   lambda c, i: (c, 0, 0)),
        ),
        compiler_params=pltpu.CompilerParams(
            dimension_semantics=("parallel", "arbitrary"),
        ),
    )(yhat2d, y2d)

    # Tiny final reduce (num_partials x 8 x 128 elements) + mean normalization.
    return jnp.sum(partials) / jnp.float32(n)


def _ref_loss(yhat, y, task_type):
    yhat = yhat.astype(jnp.float32)
    y = y.astype(jnp.float32)
    if task_type == "regressionL1":
        return jnp.mean(jnp.abs(yhat - y))
    if task_type == "regressionL2":
        return jnp.mean((yhat - y) ** 2)
    if task_type == "regressionMRE":
        return jnp.mean(jnp.abs(y - yhat) / y)
    raise ValueError(task_type)


if __name__ == "__main__":
    key = jax.random.PRNGKey(0)
    k1, k2, k3, k4 = jax.random.split(key, 4)

    ok = True

    # Aligned shape (no padding path): batch=2, channels=4, spatial=16x16.
    shape = (2, 4, 16, 16)
    yhat = jax.random.normal(k1, shape, dtype=jnp.float32)
    # Keep y strictly positive so MRE (division by y) is well-defined.
    y = jax.random.uniform(k2, shape, dtype=jnp.float32, minval=0.5, maxval=2.0)
    for task in ("regressionL1", "regressionL2", "regressionMRE"):
        out = jax.block_until_ready(my_loss(yhat, y, task))
        ref = jax.block_until_ready(_ref_loss(yhat, y, task))
        if not jnp.allclose(out, ref, rtol=1e-5, atol=1e-5):
            ok = False
            print(f"MISMATCH {task} {shape}: kernel={out} ref={ref}")

    # Ragged shape (exercises the pad-to-tile path).
    shape2 = (3, 5, 7)
    yhat2 = jax.random.normal(k3, shape2, dtype=jnp.float32)
    y2 = jax.random.uniform(k4, shape2, dtype=jnp.float32, minval=0.5, maxval=2.0)
    for task in ("regressionL1", "regressionL2", "regressionMRE"):
        out = jax.block_until_ready(my_loss(yhat2, y2, task))
        ref = jax.block_until_ready(_ref_loss(yhat2, y2, task))
        if not jnp.allclose(out, ref, rtol=1e-5, atol=1e-5):
            ok = False
            print(f"MISMATCH {task} {shape2}: kernel={out} ref={ref}")

    if ok:
        print("KERNEL_OK")
</pallas_src>

<mosaic_0001>
module attributes {stable_mosaic.version = 11 : i64} {
  func.func @_loss_partial_kernel(%arg0: i32, %arg1: i32, %arg2: memref<16x128xf32, #tpu.memory_space<vmem>>, %arg3: memref<16x128xf32, #tpu.memory_space<vmem>>, %arg4: memref<1x8x128xf32, #tpu.memory_space<vmem>>) attributes {dimension_semantics = [#tpu.dimension_semantics<parallel>, #tpu.dimension_semantics<arbitrary>], iteration_bounds = array<i64: 1, 1>, scalar_prefetch = 0 : i64, scratch_operands = 0 : i64, tpu.core_type = #tpu.core_type<tc>, window_params = [{transform_indices = @transform_0, window_bounds = array<i64: 16, 128>}, {transform_indices = @transform_1, window_bounds = array<i64: 16, 128>}, {transform_indices = @transform_2, window_bounds = array<i64: 1, 8, 128>}]} {
    %c0_i32 = arith.constant 0 : i32
    %0 = arith.cmpi eq, %arg1, %c0_i32 : i32
    %1 = arith.extui %0 : i1 to i32
    %c0_i32_0 = arith.constant 0 : i32
    %2 = arith.cmpi ne, %1, %c0_i32_0 : i32
    scf.if %2 {
      %cst = arith.constant 0.000000e+00 : f32
      %8 = vector.broadcast %cst : f32 to vector<1x8x128xf32>
      %c0 = arith.constant 0 : index
      %c0_3 = arith.constant 0 : index
      %c0_4 = arith.constant 0 : index
      %9 = vector.load %arg4[%c0, %c0_3, %c0_4] : memref<1x8x128xf32, #tpu.memory_space<vmem>>, vector<1x8x128xf32>
      tpu.vector_store %arg4[%c0, %c0_3, %c0_4], %8 {strides = array<i32>} : memref<1x8x128xf32, #tpu.memory_space<vmem>>, vector<1x8x128xf32>,
    } else {
    }
    %c1_i32 = arith.constant 1 : i32
    %3 = arith.muli %arg0, %c1_i32 : i32
    %4 = arith.addi %3, %arg1 : i32
    %c1_i32_1 = arith.constant 1 : i32
    %5 = arith.cmpi slt, %4, %c1_i32_1 : i32
    %6 = arith.extui %5 : i1 to i32
    %c0_i32_2 = arith.constant 0 : i32
    %7 = arith.cmpi ne, %6, %c0_i32_2 : i32
    scf.if %7 {
      %c0 = arith.constant 0 : index
      %c0_3 = arith.constant 0 : index
      %8 = vector.load %arg2[%c0, %c0_3] : memref<16x128xf32, #tpu.memory_space<vmem>>, vector<16x128xf32>
      %c0_4 = arith.constant 0 : index
      %c0_5 = arith.constant 0 : index
      %9 = vector.load %arg3[%c0_4, %c0_5] : memref<16x128xf32, #tpu.memory_space<vmem>>, vector<16x128xf32>
      %10 = arith.subf %9, %8 : vector<16x128xf32>
      %11 = math.absf %10 : vector<16x128xf32>
      %12 = vector.shape_cast %11 : vector<16x128xf32> to vector<2x8x128xf32>
      %cst = arith.constant dense<0.000000e+00> : vector<8x128xf32>
      %13 = vector.multi_reduction <add>, %12, %cst [0] : vector<2x8x128xf32> to vector<8x128xf32>
      %c0_6 = arith.constant 0 : index
      %c0_7 = arith.constant 0 : index
      %c0_8 = arith.constant 0 : index
      %14 = vector.load %arg4[%c0_6, %c0_7, %c0_8] : memref<1x8x128xf32, #tpu.memory_space<vmem>>, vector<1x8x128xf32>
      %15 = vector.shape_cast %13 : vector<8x128xf32> to vector<1x8x128xf32>
      %16 = arith.addf %14, %15 : vector<1x8x128xf32>
      %c0_9 = arith.constant 0 : index
      %c0_10 = arith.constant 0 : index
      %c0_11 = arith.constant 0 : index
      %17 = vector.load %arg4[%c0_9, %c0_10, %c0_11] : memref<1x8x128xf32, #tpu.memory_space<vmem>>, vector<1x8x128xf32>
      tpu.vector_store %arg4[%c0_9, %c0_10, %c0_11], %16 {strides = array<i32>} : memref<1x8x128xf32, #tpu.memory_space<vmem>>, vector<1x8x128xf32>,
    } else {
    }
    return
  }
  func.func @transform_0(%arg0: i32, %arg1: i32) -> (i32, i32) {
    %c1_i32 = arith.constant 1 : i32
    %0 = arith.muli %arg0, %c1_i32 : i32
    %1 = arith.addi %0, %arg1 : i32
    %c0_i32 = arith.constant 0 : i32
    %2 = arith.minsi %1, %c0_i32 : i32
    %c0_i32_0 = arith.constant 0 : i32
    %c0_i32_1 = arith.constant 0 : i32
    return %2, %c0_i32_0 : i32, i32
  }
  func.func @transform_1(%arg0: i32, %arg1: i32) -> (i32, i32) {
    %c1_i32 = arith.constant 1 : i32
    %0 = arith.muli %arg0, %c1_i32 : i32
    %1 = arith.addi %0, %arg1 : i32
    %c0_i32 = arith.constant 0 : i32
    %2 = arith.minsi %1, %c0_i32 : i32
    %c0_i32_0 = arith.constant 0 : i32
    %c0_i32_1 = arith.constant 0 : i32
    return %2, %c0_i32_0 : i32, i32
  }
  func.func @transform_2(%arg0: i32, %arg1: i32) -> (i32, i32, i32) {
    %c0_i32 = arith.constant 0 : i32
    %c0_i32_0 = arith.constant 0 : i32
    %c0_i32_1 = arith.constant 0 : i32
    return %arg0, %c0_i32, %c0_i32_0 : i32, i32, i32
  }
}

</mosaic_0001>

<bundles_post_ra>
// kernel: tpu_custom_call.1
= control target key start
LH: loop header
LB: loop body
LE: loop exit
PB: predicated region body
PF: predicated region fallthrough
CT: control target
= control target key end

     0   :  { %7 = vsyncpa [#allocation3], 0  ;;  %s236_s0 = inlined_call_operand.hbm [shape: f32[16,128], index: 0, kind: input, shape index: {}]   ;;  %s237_s1 = inlined_call_operand.hbm [shape: f32[16,128], index: 1, kind: input, shape index: {}]   ;;  %s238_s2 = inlined_call_operand.hbm [shape: f32[1,8,128], index: 2, kind: output, shape index: {}]  }
   0x1   :  { %8 = vsyncpa [#allocation6], 0 }
   0x2   :  { %9 = vsyncpa [#allocation4], 0  ;;  %s180_s9 = smov [#allocation2]   ;;  %s108_s13 = scalar_lea.hbm %s236_s0, 256 }
   0x3   :  { %s21_s10 = sshll.u32 %s180_s9, 4  ;;  %p109_p0 = scmp.ne.s32.totalorder %s236_s0, %s108_s13  ;;  %s22_s10 = int_to_ptr.vmem [resolvable:$true] %s21_s10 }
   0x4   :  { %p112_p1 = scmp.lt.u32.totalorder %s108_s13, %s236_s0 }
   0x6   :  { %p114_p2 = pnand %p112_p1, %p109_p0 }
   0x8   :  { %117 = shalt.err (!%p114_p2)
}
   0x9   :  { %s118_s18 = scalar_lea.vmem %s22_s10, 256  ;;  %p123_p4 = scmp.lt.s32.totalorder %s22_s10, %s22_s10 }
   0xa   :  { %p119_p3 = scmp.ne.s32.totalorder %s22_s10, %s118_s18  ;;  %p124_p5 = scmp.lt.s32.totalorder %s118_s18, %s118_s18 }
   0xc   :  { %p125_p6 = por %p124_p5, %p123_p4 }
   0xe   :  { %p126_p7 = pnand %p125_p6, %p119_p3 }
  0x10   :  { %129 = shalt.err (!%p126_p7)
}
  0x11   :  { %s181_s19 = smov 128   ;;  %s182_s20 = smov 8  }
  0x12   :  { %27 = dma.hbm_to_vmem [thread:$0]  %s236_s0, 256, %s22_s10, [#allocation3], %s181_s19, %s181_s19, %s182_s20  }
  0x13   :  { %s183_s23 = smov [#allocation5]   ;;  %s130_s27 = scalar_lea.hbm %s237_s1, 256 }
  0x14   :  { %s39_s24 = sshll.u32 %s183_s23, 4  ;;  %p131_p8 = scmp.ne.s32.totalorder %s237_s1, %s130_s27  ;;  %s40_s24 = int_to_ptr.vmem [resolvable:$true] %s39_s24 }
  0x15   :  { %p134_p9 = scmp.lt.u32.totalorder %s130_s27, %s237_s1 }
  0x17   :  { %p136_p10 = pnand %p134_p9, %p131_p8 }
  0x19   :  { %139 = shalt.err (!%p136_p10)
}
  0x1a   :  { %s140_s4 = scalar_lea.vmem %s40_s24, 256  ;;  %p145_p12 = scmp.lt.s32.totalorder %s40_s24, %s40_s24 }
  0x1b   :  { %p141_p11 = scmp.ne.s32.totalorder %s40_s24, %s140_s4  ;;  %p146_p13 = scmp.lt.s32.totalorder %s140_s4, %s140_s4 }
  0x1d   :  { %p147_p0 = por %p146_p13, %p145_p12 }
  0x1f   :  { %p148_p1 = pnand %p147_p0, %p141_p11 }
  0x21   :  { %151 = shalt.err (!%p148_p1)
}
  0x22   :  { %45 = dma.hbm_to_vmem [thread:$0]  %s237_s1, 256, %s40_s24, [#allocation6], %s181_s19, %s181_s19, %s182_s20  }
  0x23   :  { %174 = dma.done.wait [#allocation3], 256  }
  0x24   :  { %175 = vsyncadd [#allocation3], 4294967040 }
  0x25   :  { %176 = dma.done.wait [#allocation6], 256  }
  0x26   :  { %177 = vsyncadd [#allocation6], 4294967040  ;;  %v70_v0 = vld [vmem:[#allocation2] sm:$0xff]  ;;  %v71_v1 = vld [vmem:[#allocation2 + $0x8] sm:$0xff]  ;;  %s184_s6 = smov [#allocation7]  }
  0x27   :  { %v72_v2 = vld [vmem:[#allocation5] sm:$0xff]  ;;  %v73_v3 = vld [vmem:[#allocation5 + $0x8] sm:$0xff]  ;;  %s88_s7 = sshll.u32 %s184_s6, 4  ;;  %s89_s7 = int_to_ptr.vmem [resolvable:$true] %s88_s7 }
  0x28   :  { %v74_v4 = vsub.f32 %v72_v2, %v70_v0  ;;  %v75_v5 = vsub.f32 %v73_v3, %v71_v1  ;;  %s152_s8 = scalar_lea.vmem %s89_s7, 128  ;;  %p157_p3 = scmp.lt.s32.totalorder %s89_s7, %s89_s7 }
  0x29   :  { %p153_p2 = scmp.ne.s32.totalorder %s89_s7, %s152_s8  ;;  %p158_p4 = scmp.lt.s32.totalorder %s152_s8, %s152_s8 }
  0x2a   :  { %v76_v6 = vand.u32 2147483647, %v74_v4  ;;  %v77_v7 = vand.u32 2147483647, %v75_v5 }
  0x2b   :  { %p159_p5 = por %p158_p4, %p157_p3 }
  0x2c   :  { %v78_v8 = vadd.f32 %v77_v7, %v76_v6 }
  0x2d   :  { %p160_p6 = pnand %p159_p5, %p153_p2 }
  0x2e   :  { %81 = vst [vmem:[#allocation7] sm:$0xff] %v78_v8 }
  0x2f   :  { %163 = shalt.err (!%p160_p6)
}
  0x30   :  { %s164_s10 = scalar_lea.hbm %s238_s2, 128 }
  0x31   :  { %p165_p7 = scmp.ne.s32.totalorder %s238_s2, %s164_s10  ;;  %p168_p8 = scmp.lt.u32.totalorder %s164_s10, %s238_s2 }
  0x33   :  { %p170_p9 = pnand %p168_p8, %p165_p7 }
  0x35   :  { %173 = shalt.err (!%p170_p9)
}
  0x36   :  { %91 = dma.vmem_to_hbm [thread:$0]  %s89_s7, 128, %s238_s2, [#allocation4]  }
  0x37   :  { %178 = dma.done.wait [#allocation4], 128  }
  0x38   :  { %179 = vsyncadd [#allocation4], 4294967168 }
  0x39   :  { %95 = vsyncpa [#allocation3], 1 }
  0x3a   :  { %96 = vsyncpa [#allocation6], 1 }
  0x3b   :  { %97 = vsyncpa [#allocation4], 1 }

</bundles_post_ra>
